<compile_context>
chip_gen: v7x
topology: tpu7x:2x2x1
jax: 0.10.0
libtpu: 0.0.40
codegen_flags: <defaults>
</compile_context>

<pallas_src>
import jax
import jax.numpy as jnp
import numpy as np
from jax.experimental import pallas as pl
from jax.experimental.pallas import tpu as pltpu


def _time_embedding_kernel(t_ref, inv_freq_ref, phase_ref, o_ref):
    # t_ref:        (1, TB)   timesteps along lanes
    # inv_freq_ref: (dim, 1)  1 / max_period**(2*i/dim)  (compile-time table)
    # phase_ref:    (dim, 1)  0 for even i, pi/2 for odd i  (cos(x) = sin(x + pi/2))
    # o_ref:        (dim, TB) transposed embedding tile (lane-dense store)
    o_ref[...] = jnp.sin(t_ref[...] * inv_freq_ref[...] + phase_ref[...])


def time_embedding(x, dim=64, max_period=100):
    """Pallas TPU implementation of TimeEmbedding.forward.

    x: (B, F) float32, only x[:, 0] is used.
    returns: (B, dim) float32
    """
    B = x.shape[0]

    # --- compile-time tables (computed in float64 numpy, cast once) ----------
    idx = np.arange(dim, dtype=np.float64)
    inv_freq = (1.0 / (float(max_period) ** (2.0 * idx / float(dim)))).astype(np.float32)
    phase = np.where(idx % 2 == 0, 0.0, np.pi / 2.0).astype(np.float32)
    inv_freq_col = jnp.asarray(inv_freq).reshape(dim, 1)
    phase_col = jnp.asarray(phase).reshape(dim, 1)

    # --- only the used column, laid out along lanes, padded to the tile ------
    t_row = x[:, 0].astype(jnp.float32).reshape(1, B)       # (1, B)
    LANE = 128
    b_lane = ((B + LANE - 1) // LANE) * LANE
    TB = min(8192, b_lane)                  # lane-dense tile: multiple of 128,
    B_pad = ((B + TB - 1) // TB) * TB       # big enough to amortize per-step overhead,
    if B_pad != B:                          # small enough for v7x VMEM (~4 MiB dbl-buf)
        t_row = jnp.pad(t_row, ((0, 0), (0, B_pad - B)))

    out_t = pl.pallas_call(
        _time_embedding_kernel,
        out_shape=jax.ShapeDtypeStruct((dim, B_pad), jnp.float32),
        grid_spec=pltpu.PrefetchScalarGridSpec(
            num_scalar_prefetch=0,
            grid=(B_pad // TB,),
            in_specs=[
                pl.BlockSpec((1, TB), lambda i: (0, i)),    # timestep tile
                pl.BlockSpec((dim, 1), lambda i: (0, 0)),   # constant freq table
                pl.BlockSpec((dim, 1), lambda i: (0, 0)),   # constant phase table
            ],
            out_specs=pl.BlockSpec((dim, TB), lambda i: (0, i)),
        ),
        compiler_params=pltpu.CompilerParams(
            dimension_semantics=("parallel",),
        ),
    )(t_row, inv_freq_col, phase_col)

    # layout plumbing only: back to the module's (B, dim) convention
    return out_t[:, :B].T


def time_embedding_ref(x, dim=64, max_period=100):
    """Pure-JAX reference mirroring the PyTorch loop exactly."""
    t = x[:, 0].astype(jnp.float32)  # (B,)
    cols = []
    for i in range(dim):
        arg = t / (max_period ** (2 * i / dim))
        cols.append(jnp.sin(arg) if i % 2 == 0 else jnp.cos(arg))
    return jnp.stack(cols, axis=1)


if __name__ == "__main__":
    key = jax.random.PRNGKey(0)
    B, F, DIM = 8, 4, 64
    x = jax.random.uniform(key, (B, F), dtype=jnp.float32) * 50.0  # timesteps in [0, 50)

    y = time_embedding(x, dim=DIM, max_period=100)
    jax.block_until_ready(y)

    y_ref = time_embedding_ref(x, dim=DIM, max_period=100)
    assert y.shape == (B, DIM)
    # atol loosened slightly vs 1e-5: reciprocal-mult + sin(x+pi/2) instead of
    # divide + cos introduces a few f32 ulps on args up to ~50.
    assert jnp.allclose(y, y_ref, atol=2e-5, rtol=1e-5), "mismatch vs reference"

    print("KERNEL_OK")
</pallas_src>

<mosaic_0001>
module attributes {stable_mosaic.version = 11 : i64} {
  func.func @_time_embedding_kernel(%arg0: i32, %arg1: memref<1x128xf32, #tpu.memory_space<vmem>>, %arg2: memref<64x1xf32, #tpu.memory_space<vmem>>, %arg3: memref<64x1xf32, #tpu.memory_space<vmem>>, %arg4: memref<64x128xf32, #tpu.memory_space<vmem>>) attributes {dimension_semantics = [#tpu.dimension_semantics<parallel>], iteration_bounds = array<i64: 1>, scalar_prefetch = 0 : i64, scratch_operands = 0 : i64, tpu.core_type = #tpu.core_type<tc>, window_params = [{transform_indices = @transform_0, window_bounds = array<i64: 1, 128>}, {pipeline_mode = #tpu.pipeline_mode<synchronous>, transform_indices = @transform_1, window_bounds = array<i64: 64, 1>}, {pipeline_mode = #tpu.pipeline_mode<synchronous>, transform_indices = @transform_2, window_bounds = array<i64: 64, 1>}, {transform_indices = @transform_3, window_bounds = array<i64: 64, 128>}]} {
    %c0 = arith.constant 0 : index
    %c0_0 = arith.constant 0 : index
    %0 = vector.load %arg1[%c0, %c0_0] : memref<1x128xf32, #tpu.memory_space<vmem>>, vector<1x128xf32>
    %c0_1 = arith.constant 0 : index
    %c0_2 = arith.constant 0 : index
    %1 = vector.load %arg2[%c0_1, %c0_2] : memref<64x1xf32, #tpu.memory_space<vmem>>, vector<64x1xf32>
    %2 = vector.broadcast %0 : vector<1x128xf32> to vector<64x128xf32>
    %3 = vector.broadcast %1 : vector<64x1xf32> to vector<64x128xf32>
    %4 = arith.mulf %2, %3 : vector<64x128xf32>
    %c0_3 = arith.constant 0 : index
    %c0_4 = arith.constant 0 : index
    %5 = vector.load %arg3[%c0_3, %c0_4] : memref<64x1xf32, #tpu.memory_space<vmem>>, vector<64x1xf32>
    %6 = vector.broadcast %5 : vector<64x1xf32> to vector<64x128xf32>
    %7 = arith.addf %4, %6 : vector<64x128xf32>
    %8 = math.sin %7 : vector<64x128xf32>
    %c0_5 = arith.constant 0 : index
    %c0_6 = arith.constant 0 : index
    %9 = vector.load %arg4[%c0_5, %c0_6] : memref<64x128xf32, #tpu.memory_space<vmem>>, vector<64x128xf32>
    tpu.vector_store %arg4[%c0_5, %c0_6], %8 {strides = array<i32>} : memref<64x128xf32, #tpu.memory_space<vmem>>, vector<64x128xf32>,
    return
  }
  func.func @transform_0(%arg0: i32) -> (i32, i32) {
    %c0_i32 = arith.constant 0 : i32
    %c0_i32_0 = arith.constant 0 : i32
    return %c0_i32, %arg0 : i32, i32
  }
  func.func @transform_1(%arg0: i32) -> (i32, i32) {
    %c0_i32 = arith.constant 0 : i32
    %c0_i32_0 = arith.constant 0 : i32
    %c0_i32_1 = arith.constant 0 : i32
    return %c0_i32, %c0_i32_0 : i32, i32
  }
  func.func @transform_2(%arg0: i32) -> (i32, i32) {
    %c0_i32 = arith.constant 0 : i32
    %c0_i32_0 = arith.constant 0 : i32
    %c0_i32_1 = arith.constant 0 : i32
    return %c0_i32, %c0_i32_0 : i32, i32
  }
  func.func @transform_3(%arg0: i32) -> (i32, i32) {
    %c0_i32 = arith.constant 0 : i32
    %c0_i32_0 = arith.constant 0 : i32
    return %c0_i32, %arg0 : i32, i32
  }
}

</mosaic_0001>

<bundles_post_ra>
// kernel: tpu_custom_call.1
= control target key start
LH: loop header
LB: loop body
LE: loop exit
PB: predicated region body
PF: predicated region fallthrough
CT: control target
= control target key end

     0   :  { %v1123_v2 = vmov 0   ;;  %s1824_s0 = inlined_call_operand.vmem [shape: f32[1,128], index: 0, kind: input, shape index: {}]   ;;  %s1825_s1 = inlined_call_operand.vmem [shape: f32[64,1], index: 1, kind: input, shape index: {}]   ;;  %s1826_s2 = inlined_call_operand.vmem [shape: f32[64,1], index: 2, kind: input, shape index: {}]   ;;  %s1827_s3 = inlined_call_operand.hbm [shape: f32[64,128], index: 3, kind: output, shape index: {}]  }
   0x1   :  { %v18_v0 = vld [vmem:[%s1825_s1 + $0x10] sm:$0xff]  ;;  %v16_v1 = vld [vmem:[%s1825_s1] sm:$0xff]  ;;  %1066 = vset.pattern.permute.xlu1 %v1123_v2  ;;  %1065 = vset.pattern.permute.xlu0 %v1123_v2  ;;  %v19_v3 = vld [vmem:[%s1825_s1 + $0x18] sm:$0xff] }
   0x2   :  { %42 = vperm.xlu1 %1066, %v18_v0   ;;  %32 = vperm.xlu0 %1065, %v16_v1   ;;  %v17_v4 = vld [vmem:[%s1825_s1 + $0x8] sm:$0xff] }
   0x3   :  { %8 = vsyncpa [#allocation3], 0  ;;  %v21_v5 = vld [vmem:[%s1825_s1 + $0x28] sm:$0xff]  ;;  %v20_v6 = vld [vmem:[%s1825_s1 + $0x20] sm:$0xff] }
   0x4   :  { %v23_v7 = vld [vmem:[%s1825_s1 + $0x38] sm:$0xff]  ;;  %v22_v8 = vld [vmem:[%s1825_s1 + $0x30] sm:$0xff]  ;;  %v79_v9 = vld [vmem:[%s1826_s2 + $0x8] sm:$0xff] }
   0x5   :  { %v78_v10 = vld [vmem:[%s1826_s2] sm:$0xff]  ;;  %v81_v11 = vld [vmem:[%s1826_s2 + $0x18] sm:$0xff]  ;;  %v80_v12 = vld [vmem:[%s1826_s2 + $0x10] sm:$0xff] }
   0x6   :  { %47 = vperm.xlu1 %1066, %v19_v3   ;;  %37 = vperm.xlu0 %1065, %v17_v4   ;;  %v83_v13 = vld [vmem:[%s1826_s2 + $0x28] sm:$0xff]  ;;  %v82_v14 = vld [vmem:[%s1826_s2 + $0x20] sm:$0xff]  ;;  %v85_v15 = vld [vmem:[%s1826_s2 + $0x38] sm:$0xff] }
   0x7   :  { %v84_v16 = vld [vmem:[%s1826_s2 + $0x30] sm:$0xff]  ;;  %v990_v21 = vld [vmem:[%s1824_s0] ss:$0 sm:$0xff]  ;;  %s1130_s0 = smov [#allocation2]  }
   0x8   :  { %s979_s2 = sshll.u32 %s1130_s0, 4  ;;  %s980_s2 = int_to_ptr.vmem [resolvable:$true] %s979_s2 }
   0x9   :  { %s1099_s18 = scalar_lea.vmem %s980_s2, 1024  ;;  %p1104_p1 = scmp.lt.s32.totalorder %s980_s2, %s980_s2 }
   0xa   :  { %57 = vperm.xlu1 %1066, %v21_v5   ;;  %52 = vperm.xlu0 %1065, %v20_v6   ;;  %v1124_v5 = vmov 683565275   ;;  %p1100_p0 = scmp.ne.s32.totalorder %s980_s2, %s1099_s18  ;;  %p1105_p2 = scmp.lt.s32.totalorder %s1099_s18, %s1099_s18 }
   0xc   :  { %p1106_p3 = por %p1105_p2, %p1104_p1 }
   0xe   :  { %67 = vperm.xlu1 %1066, %v23_v7   ;;  %62 = vperm.xlu0 %1065, %v22_v8   ;;  %p1107_p4 = pnand %p1106_p3, %p1100_p0 }
  0x12   :  { %93 = vperm.xlu1 %1066, %v79_v9   ;;  %88 = vperm.xlu0 %1065, %v78_v10   ;;  %v1125_v9 = vmov 2475754826  }
  0x16   :  { %103 = vperm.xlu1 %1066, %v81_v11   ;;  %98 = vperm.xlu0 %1065, %v80_v12   ;;  %v1126_v11 = vmov 2131351028  }
  0x1a   :  { %113 = vperm.xlu1 %1066, %v83_v13   ;;  %108 = vperm.xlu0 %1065, %v82_v14   ;;  %v1127_v13 = vmov 2102212464  }
  0x1e   :  { %123 = vperm.xlu1 %1066, %v85_v15   ;;  %118 = vperm.xlu0 %1065, %v84_v16   ;;  %v1128_v15 = vmov 920167782  }
  0x81   :  { %v43_v17 = vpop.permute.xlu1 %42  ;;  %v33_v18 = vpop.permute.xlu0 %32 }
  0x82   :  { %v70_v30 = vmul.f32 %v990_v21, %v33_v18  ;;  %v72_v57 = vmul.f32 %v990_v21, %v43_v17 }
  0x85   :  { %v48_v19 = vpop.permute.xlu1 %47  ;;  %v38_v20 = vpop.permute.xlu0 %37 }
  0x86   :  { %v71_v31 = vmul.f32 %v990_v21, %v38_v20  ;;  %v73_v36 = vmul.f32 %v990_v21, %v48_v19 }
  0x89   :  { %v58_v22 = vpop.permute.xlu1 %57  ;;  %v53_v23 = vpop.permute.xlu0 %52 }
  0x8a   :  { %v1204_v24 = vmul.f32 %v990_v21, %v58_v22  ;;  %v1206_v25 = vmul.f32 %v990_v21, %v53_v23  ;;  %v1129_v22 = vmov 1326507024  }
  0x8d   :  { %v68_v26 = vpop.permute.xlu1 %67  ;;  %v63_v27 = vpop.permute.xlu0 %62 }
  0x8e   :  { %v1208_v28 = vmul.f32 %v990_v21, %v68_v26  ;;  %v1210_v29 = vmul.f32 %v990_v21, %v63_v27 }
  0x91   :  { %v94_v32 = vpop.permute.xlu1 %93  ;;  %v89_v33 = vpop.permute.xlu0 %88 }
  0x92   :  { %v1212_v34 = vadd.f32 %v94_v32, %v71_v31  ;;  %v1214_v35 = vadd.f32 %v89_v33, %v70_v30 }
  0x94   :  { %v238_v37 = vand.u32 2147483647, %v1212_v34  ;;  %v241_v38 = vand.u32 2139095040, %v1212_v34  ;;  %v134_v39 = vand.u32 2147483647, %v1214_v35  ;;  %v137_v40 = vand.u32 2139095040, %v1214_v35 }
  0x95   :  { %v104_v41 = vpop.permute.xlu1 %103  ;;  %v99_v56 = vpop.permute.xlu0 %98  ;;  %vm240_vm13 = vcmp.lt.s32.totalorder %v1212_v34, 0  ;;  %vm136_vm15 = vcmp.lt.s32.totalorder %v1214_v35, 0 }
  0x96   :  { %v242_v42 = vshrl.u32 %v241_v38, 23  ;;  %v245_v43 = vand.u32 8388607, %v238_v37  ;;  %v1222_v44 = vadd.f32 %v104_v41, %v73_v36  ;;  %v138_v45 = vshrl.u32 %v137_v40, 23 }
  0x97   :  { %v141_v46 = vand.u32 8388607, %v134_v39  ;;  %v1228_v63 = vadd.f32 %v99_v56, %v72_v57  ;;  %vm1335_vm14 = vcmp.le.f32.partialorder %v238_v37, 0.7853982 }
  0x98   :  { %v995_v47 = vadd.s32 4294967169, %v242_v42  ;;  %v991_v48 = vadd.s32 4294967169, %v138_v45  ;;  %v449_v49 = vand.u32 2139095040, %v1222_v44  ;;  %v246_v50 = vor.u32 8388608, %v245_v43 }
  0x99   :  { %v142_v52 = vor.u32 8388608, %v141_v46  ;;  %v446_v54 = vand.u32 2147483647, %v1222_v44 }
  0x9a   :  { %v248_v51 = vadd.s32 1, %v995_v47  ;;  %v144_v53 = vadd.s32 1, %v991_v48  ;;  %v450_v55 = vshrl.u32 %v449_v49, 23  ;;  %v1230_v0 = vshll.u32 %v246_v50, 8 }
  0x9b   :  { %v1234_v2 = vshll.u32 %v142_v52, 8  ;;  %v1238_v3 = vand.u32 8388607, %v446_v54 }
  0x9c   :  { %vm249_vm0 = vcmp.gt.s32.totalorder %v248_v51, 0  ;;  %vm145_vm1 = vcmp.gt.s32.totalorder %v144_v53, 0  ;;  %v1003_v59 = vadd.s32 4294967169, %v450_v55 }
  0x9d   :  { %v250_v58 = vsel %vm249_vm0, %v248_v51, 0  ;;  %v146_v62 = vsel %vm145_vm1, %v144_v53, 0 }
  0x9e   :  { %v251_v60 = vshrl.u32 %v250_v58, 5  ;;  %v252_v61 = vand.u32 31, %v250_v58  ;;  %v1232_v1 = vshrl.u32 %v146_v62, 5  ;;  %v148_v7 = vand.u32 31, %v146_v62 }
  0x9f   :  { %v1241_v8 = vadd.s32 1, %v1003_v59 }
  0xa0   :  { %v253_v4 = vsub.s32 32, %v252_v61  ;;  %v255_v6 = vshll.u32 %v1124_v5, %v252_v61  ;;  %v258_v10 = vshll.u32 %v1125_v9, %v252_v61  ;;  %v261_v12 = vshll.u32 %v1126_v11, %v252_v61 }
  0xa1   :  { %v264_v14 = vshll.u32 %v1127_v13, %v252_v61  ;;  %v267_v16 = vshll.u32 %v1128_v15, %v252_v61  ;;  %vm270_vm2 = vcmp.lt.s32.totalorder %v251_v60, 1  ;;  %vm271_vm3 = vcmp.lt.s32.totalorder %v251_v60, 2 }
  0xa2   :  { %v256_v17 = vshrl.u32 %v1125_v9, %v253_v4  ;;  %v259_v18 = vshrl.u32 %v1126_v11, %v253_v4  ;;  %v262_v19 = vshrl.u32 %v1127_v13, %v253_v4  ;;  %v254_v20 = vshrl.u32 %v1124_v5, %v253_v4 }
  0xa3   :  { %v265_v21 = vshrl.u32 %v1128_v15, %v253_v4  ;;  %v268_v23 = vshrl.u32 %v1129_v22, %v253_v4  ;;  %v149_v31 = vsub.s32 32, %v148_v7  ;;  %vm272_vm4 = vcmp.lt.s32.totalorder %v251_v60, 3 }
  0xa4   :  { %v257_v26 = vor.u32 %v256_v17, %v255_v6  ;;  %v260_v27 = vor.u32 %v259_v18, %v258_v10  ;;  %v263_v30 = vor.u32 %v262_v19, %v261_v12  ;;  %vm273_vm5 = vcmp.lt.s32.totalorder %v251_v60, 4 }
  0xa5   :  { %v266_v32 = vor.u32 %v265_v21, %v264_v14  ;;  %v269_v33 = vor.u32 %v268_v23, %v267_v16  ;;  %v151_v46 = vshll.u32 %v1124_v5, %v148_v7  ;;  %v152_v49 = vshrl.u32 %v1125_v9, %v149_v31 }
  0xa6   :  { %v274_v36 = vsel %vm270_vm2, %v254_v20, %v257_v26  ;;  %v275_v38 = vsel %vm273_vm5, %v263_v30, 2102212464  ;;  %v278_v40 = vsel %vm270_vm2, %v257_v26, %v260_v27  ;;  %v282_v41 = vsel %vm270_vm2, %v260_v27, %v263_v30 }
  0xa7   :  { %v276_v42 = vsel %vm272_vm4, %v260_v27, %v275_v38  ;;  %v279_v43 = vsel %vm273_vm5, %v266_v32, 920167782  ;;  %v283_v45 = vsel %vm273_vm5, %v269_v33, 1326507024  ;;  %v154_v50 = vshll.u32 %v1125_v9, %v148_v7 }
  0xa8   :  { %v280_v47 = vsel %vm272_vm4, %v263_v30, %v279_v43  ;;  %v284_v48 = vsel %vm272_vm4, %v266_v32, %v283_v45  ;;  %v277_v51 = vsel %vm271_vm3, %v274_v36, %v276_v42  ;;  %v155_v55 = vshrl.u32 %v1126_v11, %v149_v31 }
  0xa9   :  { %v281_v52 = vsel %vm271_vm3, %v278_v40, %v280_v47  ;;  %v285_v53 = vsel %vm271_vm3, %v282_v41, %v284_v48  ;;  %v153_v61 = vor.u32 %v152_v49, %v151_v46  ;;  %v157_v4 = vshll.u32 %v1126_v11, %v148_v7 }
  0xaa   :  { %v1264_v56 = vmul.u32.u64.low %v1230_v0, %v285_v53  ;;  %v1265_v57 = vmul.u32.u64.high %v1230_v0, %v285_v53, %v1264_v56  ;;  %v1268_v58 = vmul.u32.u64.low %v1230_v0, %v281_v52  ;;  %v1269_v59 = vmul.u32.u64.high %v1230_v0, %v281_v52, %v1268_v58 }
  0xab   :  { %v156_v62 = vor.u32 %v155_v55, %v154_v50  ;;  %v158_v6 = vshrl.u32 %v1127_v13, %v149_v31  ;;  %v150_v10 = vshrl.u32 %v1124_v5, %v149_v31  ;;  %v160_v60 = vshll.u32 %v1127_v13, %v148_v7 }
  0xac   :  { %v161_v12 = vshrl.u32 %v1128_v15, %v149_v31  ;;  %v164_v14 = vshrl.u32 %v1129_v22, %v149_v31  ;;  %v293_v16 = vmul.u32 %v1230_v0, %v277_v51  ;;  %v163_v18 = vshll.u32 %v1128_v15, %v148_v7 }
  0xad   :  { %v159_v17 = vor.u32 %v158_v6, %v157_v4  ;;  %vm166_vm6 = vcmp.lt.s32.totalorder %v1232_v1, 1  ;;  %vm295_vm7 = vc.u32 %v1265_v57, %v1268_v58  ;;  %v296_v19 = vadd.s32 1, %v1269_v59 }
  0xae   :  { %v162_v20 = vor.u32 %v161_v12, %v160_v60  ;;  %vm167_vm8 = vcmp.lt.s32.totalorder %v1232_v1, 2  ;;  %v165_v21 = vor.u32 %v164_v14, %v163_v18  ;;  %vm168_vm9 = vcmp.lt.s32.totalorder %v1232_v1, 3 }
  0xaf   :  { %vm169_vm10 = vcmp.lt.s32.totalorder %v1232_v1, 4  ;;  %v174_v23 = vsel %vm166_vm6, %v153_v61, %v156_v62  ;;  %v297_v0 = vsel %vm295_vm7, %v296_v19, %v1269_v59  ;;  %v178_v7 = vsel %vm166_vm6, %v156_v62, %v159_v17 }
  0xb0   :  { %v171_v26 = vsel %vm169_vm10, %v159_v17, 2102212464  ;;  %v175_v27 = vsel %vm169_vm10, %v162_v20, 920167782  ;;  %v298_v30 = vadd.s32 %v297_v0, %v293_v16  ;;  %v170_v31 = vsel %vm166_vm6, %v150_v10, %v153_v61 }
  0xb1   :  { %v176_v32 = vsel %vm168_vm9, %v159_v17, %v175_v27  ;;  %v179_v33 = vsel %vm169_vm10, %v165_v21, 1326507024  ;;  %v172_v36 = vsel %vm168_vm9, %v156_v62, %v171_v26  ;;  %vm457_vm11 = vcmp.gt.s32.totalorder %v1241_v8, 0 }
  0xb2   :  { %v177_v38 = vsel %vm167_vm8, %v174_v23, %v176_v32  ;;  %v180_v40 = vsel %vm168_vm9, %v162_v20, %v179_v33  ;;  %v299_v41 = vadd.s32 536870912, %v298_v30  ;;  %v458_v48 = vsel %vm457_vm11, %v1241_v8, 0 }
  0xb3   :  { %v181_v42 = vsel %vm167_vm8, %v178_v7, %v180_v40  ;;  %v1292_v43 = vmul.u32.u64.low %v1234_v2, %v177_v38  ;;  %v1293_v45 = vmul.u32.u64.high %v1234_v2, %v177_v38, %v1292_v43  ;;  %v173_v50 = vsel %vm167_vm8, %v170_v31, %v172_v36 }
  0xb4   :  { %v1297_v46 = vmul.u32.u64.low %v1234_v2, %v181_v42  ;;  %v1298_v47 = vmul.u32.u64.high %v1234_v2, %v181_v42, %v1297_v46  ;;  %v300_v49 = vshrl.u32 %v299_v41, 30  ;;  %v460_v51 = vand.u32 31, %v458_v48 }
  0xb5   :  { %v345_v52 = vand.u32 2139095040, %v1228_v63  ;;  %v192_v55 = vadd.s32 1, %v1293_v45  ;;  %v454_v56 = vor.u32 8388608, %v1238_v3  ;;  %v189_v59 = vmul.u32 %v1234_v2, %v173_v50 }
  0xb6   :  { %v301_v53 = vshll.u32 %v300_v49, 30  ;;  %vm191_vm12 = vc.u32 %v1298_v47, %v1292_v43  ;;  %v461_v61 = vsub.s32 32, %v460_v51  ;;  %v342_v6 = vand.u32 2147483647, %v1228_v63 }
  0xb7   :  { %v193_v8 = vsel %vm191_vm12, %v192_v55, %v1293_v45  ;;  %v346_v1 = vshrl.u32 %v345_v52, 23  ;;  %v294_v10 = vadd.s32 %v1268_v58, %v1265_v57  ;;  %v1316_v60 = vshrl.u32 %v458_v48, 5 }
  0xb8   :  { %v1309_v62 = vsub.s32 %v298_v30, %v301_v53  ;;  %v194_v4 = vadd.s32 %v193_v8, %v189_v59  ;;  %v1318_v2 = vshll.u32 %v454_v56, 8  ;;  %v324_v12 = vsub.s32 4, %v300_v49 }
  0xb9   :  { %v464_v16 = vshrl.u32 %v1125_v9, %v461_v61  ;;  %v467_v17 = vshrl.u32 %v1126_v11, %v461_v61  ;;  %v470_v19 = vshrl.u32 %v1127_v13, %v461_v61  ;;  %v473_v20 = vshrl.u32 %v1128_v15, %v461_v61 }
  0xba   :  { %v304_v3 = vsub.s32 0, %v1309_v62  ;;  %v195_v14 = vadd.s32 536870912, %v194_v4  ;;  %v1325_v21 = vadd.s32 4294967169, %v346_v1  ;;  %v463_v58 = vshll.u32 %v1124_v5, %v460_v51 }
  0xbb   :  { %v466_v23 = vshll.u32 %v1125_v9, %v460_v51  ;;  %v1331_v0 = vand.u32 8388607, %v342_v6  ;;  %v469_v7 = vshll.u32 %v1126_v11, %v460_v51  ;;  %v472_v30 = vshll.u32 %v1127_v13, %v460_v51 }
  0xbc   :  { %v996_v18 = vmin.u32 %v304_v3, %v1309_v62  ;;  %v196_v57 = vshrl.u32 %v195_v14, 30  ;;  %v476_v31 = vshrl.u32 %v1129_v22, %v461_v61  ;;  %v325_v32 = vsel %vm240_vm13, %v324_v12, %v300_v49 }
  0xbd   :  { %v465_v36 = vor.u32 %v464_v16, %v463_v58  ;;  %v468_v38 = vor.u32 %v467_v17, %v466_v23  ;;  %v471_v37 = vor.u32 %v470_v19, %v469_v7  ;;  %v474_v41 = vor.u32 %v473_v20, %v472_v30 }
  0xbe   :  { %v306_v27 = vclz %v996_v18  ;;  %v197_v33 = vshll.u32 %v196_v57, 30  ;;  %v475_v42 = vshll.u32 %v1128_v15, %v460_v51  ;;  %v220_v46 = vsub.s32 4, %v196_v57 }
  0xbf   :  { %v462_v48 = vshrl.u32 %v1124_v5, %v461_v61  ;;  %vm478_vm0 = vcmp.lt.s32.totalorder %v1316_v60, 1  ;;  %vm479_vm2 = vcmp.lt.s32.totalorder %v1316_v60, 2  ;;  %vm480_vm3 = vcmp.lt.s32.totalorder %v1316_v60, 3 }
  0xc0   :  { %v997_v40 = vadd.s32 4294967294, %v306_v27  ;;  %v1346_v45 = vsub.s32 %v194_v4, %v197_v33  ;;  %v477_v50 = vor.u32 %v476_v31, %v475_v42  ;;  %vm1354_vm4 = vcmp.le.f32.partialorder %v134_v39, 0.7853982 }
  0xc1   :  { %vm481_vm5 = vcmp.lt.s32.totalorder %v1316_v60, 4  ;;  %v486_v53 = vsel %vm478_vm0, %v465_v36, %v468_v38  ;;  %v490_v4 = vsel %vm478_vm0, %v468_v38, %v471_v37  ;;  %v327_v17 = vsel %vm1335_vm14, 0, %v325_v32 }
  0xc2   :  { %vm998_vm1 = vcmp.lt.s32.totalorder %v997_v40, 0  ;;  %v200_v51 = vsub.s32 0, %v1346_v45  ;;  %v483_v59 = vsel %vm481_vm5, %v471_v37, 2102212464  ;;  %v487_v61 = vsel %vm481_vm5, %v474_v41, 920167782 }
  0xc3   :  { %v309_v49 = vsel %vm998_vm1, 0, %v997_v40  ;;  %v488_v39 = vsel %vm480_vm3, %v471_v37, %v487_v61  ;;  %v491_v16 = vsel %vm481_vm5, %v477_v50, 1326507024  ;;  %v484_v19 = vsel %vm480_vm3, %v468_v38, %v483_v59 }
  0xc4   :  { %v310_v55 = vsub.s32 32, %v309_v49  ;;  %v314_v56 = vsub.s32 4294967266, %v309_v49  ;;  %v311_v8 = vshll.u32 %v1309_v62, %v309_v49  ;;  %v992_v1 = vmin.u32 %v200_v51, %v1346_v45 }
  0xc5   :  { %v489_v14 = vsel %vm479_vm2, %v486_v53, %v488_v39  ;;  %v482_v62 = vsel %vm478_vm0, %v462_v48, %v465_v36  ;;  %v492_v23 = vsel %vm480_vm3, %v474_v41, %v491_v16  ;;  %v190_v40 = vadd.s32 %v1292_v43, %v1298_v47  ;;  %v114_v43 = vpop.permute.xlu1 %113 }
  0xc6   :  { %v312_v3 = vshrl.u32 %v294_v10, %v310_v55  ;;  %v315_v12 = vadd.s32 127, %v314_v56  ;;  %v202_v18 = vclz %v992_v1  ;;  %v221_v10 = vsel %vm136_vm15, %v220_v46, %v196_v57 }
  0xc7   :  { %v493_v7 = vsel %vm479_vm2, %v490_v4, %v492_v23  ;;  %v1383_v30 = vmul.u32.u64.low %v1318_v2, %v489_v14  ;;  %v1384_v31 = vmul.u32.u64.high %v1318_v2, %v489_v14, %v1383_v30  ;;  %v485_v33 = vsel %vm479_vm2, %v482_v62, %v484_v19 }
  0xc8   :  { %v313_v20 = vor.u32 %v312_v3, %v311_v8  ;;  %v316_v58 = vshll.u32 %v315_v12, 23  ;;  %v993_v27 = vadd.s32 4294967294, %v202_v18  ;;  %v331_v57 = vadd.s32 3, %v327_v17 }
  0xc9   :  { %v1390_v36 = vmul.u32.u64.low %v1318_v2, %v493_v7  ;;  %v1391_v38 = vmul.u32.u64.high %v1318_v2, %v493_v7, %v1390_v36  ;;  %v352_v37 = vadd.s32 1, %v1325_v21  ;;  %v223_v48 = vsel %vm1354_vm4, 0, %v221_v10 }
  0xca   :  { %v317_v32 = vor.u32 4788187, %v316_v58  ;;  %vm994_vm6 = vcmp.lt.s32.totalorder %v993_v27, 0  ;;  %v320_v42 = vcvt.s32.f32 %v313_v20  ;;  %v501_v49 = vmul.u32 %v1318_v2, %v485_v33  ;;  %v109_v2 = vpop.permute.xlu0 %108 }
  0xcb   :  { %v205_v46 = vsel %vm994_vm6, 0, %v993_v27  ;;  %v504_v51 = vadd.s32 1, %v1384_v31  ;;  %vm503_vm7 = vc.u32 %v1391_v38, %v1383_v30  ;;  %vm353_vm8 = vcmp.gt.s32.totalorder %v352_v37, 0 }
  0xcc   :  { %v318_v41 = vand.u32 2147483647, %v317_v32  ;;  %v206_v50 = vsub.s32 32, %v205_v46  ;;  %v210_v60 = vsub.s32 4294967266, %v205_v46  ;;  %v207_v55 = vshll.u32 %v1346_v45, %v205_v46 }
  0xcd   :  { %v505_v56 = vsel %vm503_vm7, %v504_v51, %v1384_v31  ;;  %v354_v59 = vsel %vm353_vm8, %v352_v37, 0  ;;  %v227_v8 = vadd.s32 3, %v223_v48  ;;  %v1405_v12 = vadd.f32 %v114_v43, %v1204_v24 }
  0xce   :  { %v321_v53 = vmul.f32 %v320_v42, %v318_v41  ;;  %v208_v47 = vshrl.u32 %v190_v40, %v206_v50  ;;  %v211_v21 = vadd.s32 127, %v210_v60  ;;  %v506_v1 = vadd.s32 %v505_v56, %v501_v49 }
  0xcf   :  { %v356_v39 = vand.u32 31, %v354_v59  ;;  %v1412_v18 = vand.u32 3, %v331_v57  ;;  %vm448_vm9 = vcmp.lt.s32.totalorder %v1222_v44, 0  ;;  %v1416_v19 = vadd.f32 %v109_v2, %v1206_v25 }
  0xd0   :  { %v322_v61 = vxor.u32 2147483648, %v321_v53  ;;  %v209_v4 = vor.u32 %v208_v47, %v207_v55  ;;  %v212_v3 = vshll.u32 %v211_v21, 23  ;;  %v507_v14 = vadd.s32 536870912, %v506_v1 }
  0xd1   :  { %v357_v16 = vsub.s32 32, %v356_v39  ;;  %v1418_v24 = vand.u32 3, %v227_v8  ;;  %v350_v58 = vor.u32 8388608, %v1331_v0  ;;  %v657_v26 = vand.u32 2139095040, %v1405_v12 }
  0xd2   :  { %v323_v45 = vsel %vm240_vm13, %v322_v61, %v321_v53  ;;  %v213_v62 = vor.u32 4788187, %v212_v3  ;;  %v508_v20 = vshrl.u32 %v507_v14, 30  ;;  %v216_v23 = vcvt.s32.f32 %v209_v4 }
  0xd3   :  { %v326_v17 = vsel %vm1335_vm14, %v1212_v34, %v323_v45  ;;  %vm1424_vm10 = vcmp.le.f32.partialorder %v446_v54, 0.7853982  ;;  %v1428_v25 = vshrl.u32 %v354_v59, 5  ;;  %v360_v31 = vshrl.u32 %v1125_v9, %v357_v16 }
  0xd4   :  { %1067 = vcosq.f32 %v326_v17  ;;  %v214_v10 = vand.u32 2147483647, %v213_v62  ;;  %v509_v7 = vshll.u32 %v508_v20, 30  ;;  %v363_v32 = vshrl.u32 %v1126_v11, %v357_v16 }
  0xd5   :  { %1069 = vsinq.f32 %v326_v17  ;;  %v366_v0 = vshrl.u32 %v1127_v13, %v357_v16  ;;  %v368_v36 = vshll.u32 %v1127_v13, %v356_v39  ;;  %v369_v57 = vshrl.u32 %v1128_v15, %v357_v16 }
  0xd6   :  { %v217_v33 = vmul.f32 %v216_v23, %v214_v10  ;;  %vm337_vm11 = vcmp.eq.s32.totalorder %v1412_v18, 2  ;;  %v1436_v54 = vsub.s32 %v506_v1, %v509_v7  ;;  %v532_v40 = vsub.s32 4, %v508_v20 }
  0xd7   :  { %v359_v37 = vshll.u32 %v1124_v5, %v356_v39  ;;  %v362_v41 = vshll.u32 %v1125_v9, %v356_v39  ;;  %vm334_vm12 = vcmp.eq.s32.totalorder %v1412_v18, 0  ;;  %v365_v46 = vshll.u32 %v1126_v11, %v356_v39 }
  0xd8   :  { %v218_v42 = vxor.u32 2147483648, %v217_v33  ;;  %v370_v48 = vor.u32 %v369_v57, %v368_v36  ;;  %v372_v50 = vshrl.u32 %v1129_v22, %v357_v16  ;;  %vm333_vm13 = vcmp.lt.s32.totalorder %v1412_v18, 2 }
  0xd9   :  { %v502_v60 = vadd.s32 %v1383_v30, %v1391_v38  ;;  %v512_v49 = vsub.s32 0, %v1436_v54  ;;  %v361_v51 = vor.u32 %v360_v31, %v359_v37  ;;  %v364_v53 = vor.u32 %v363_v32, %v362_v41 }
  0xda   :  { %vm330_vm14 = vweird.f32 %v1212_v34  ;;  %v219_v55 = vsel %vm136_vm15, %v218_v42, %v217_v33  ;;  %v367_v43 = vor.u32 %v366_v0, %v365_v46  ;;  %v371_v47 = vshll.u32 %v1128_v15, %v356_v39 }
  0xdb   :  { %v1451_v21 = vshll.u32 %v350_v58, 8  ;;  %v222_v56 = vsel %vm1354_vm4, %v1214_v35, %v219_v55  ;;  %v1004_v30 = vmin.u32 %v512_v49, %v1436_v54  ;;  %v533_v38 = vsel %vm448_vm9, %v532_v40, %v508_v20 }
  0xdc   :  { %vm377_vm0 = vcmp.lt.s32.totalorder %v1428_v25, 4  ;;  %1071 = vcosq.f32 %v222_v56  ;;  %v373_v59 = vor.u32 %v372_v50, %v371_v47  ;;  %vm374_vm15 = vcmp.lt.s32.totalorder %v1428_v25, 1 }
  0xdd   :  { %v383_v61 = vsel %vm377_vm0, %v370_v48, 920167782  ;;  %1073 = vsinq.f32 %v222_v56  ;;  %v514_v1 = vclz %v1004_v30  ;;  %vm376_vm1 = vcmp.lt.s32.totalorder %v1428_v25, 3 }
  0xde   :  { %v1068_v8 = vpop.eup %1067  ;;  %v382_v52 = vsel %vm374_vm15, %v361_v51, %v364_v53  ;;  %v535_v4 = vsel %vm1424_vm10, 0, %v533_v38  ;;  %v358_v3 = vshrl.u32 %v1124_v5, %v357_v16  ;;  %v384_v45 = vsel %vm376_vm1, %v367_v43, %v383_v61 }
  0xdf   :  { %v1070_v39 = vpop.eup %1069  ;;  %v338_v2 = vxor.u32 2147483648, %v1068_v8  ;;  %v1005_v17 = vadd.s32 4294967294, %v514_v1  ;;  %vm375_vm2 = vcmp.lt.s32.totalorder %v1428_v25, 2  ;;  %v379_v62 = vsel %vm377_vm0, %v367_v43, 2102212464 }
  0xe0   :  { %v335_v14 = vxor.u32 2147483648, %v1070_v39  ;;  %v385_v58 = vsel %vm375_vm2, %v382_v52, %v384_v45  ;;  %v386_v10 = vsel %vm374_vm15, %v364_v53, %v367_v43  ;;  %v387_v16 = vsel %vm377_vm0, %v373_v59, 1326507024 }
  0xe1   :  { %v339_v20 = vsel %vm337_vm11, %v338_v2, %v1070_v39  ;;  %vm1006_vm3 = vcmp.lt.s32.totalorder %v1005_v17, 0  ;;  %v388_v7 = vsel %vm376_vm1, %v370_v48, %v387_v16  ;;  %v658_v31 = vshrl.u32 %v657_v26, 23 }
  0xe2   :  { %v336_v23 = vsel %vm334_vm12, %v1068_v8, %v335_v14  ;;  %v517_v33 = vsel %vm1006_vm3, 0, %v1005_v17  ;;  %v378_v0 = vsel %vm374_vm15, %v358_v3, %v361_v51  ;;  %v389_v36 = vsel %vm375_vm2, %v386_v10, %v388_v7 }
  0xe3   :  { %v340_v32 = vsel %vm333_vm13, %v336_v23, %v339_v20  ;;  %vm226_vm4 = vweird.f32 %v1214_v35  ;;  %v518_v40 = vsub.s32 32, %v517_v33  ;;  %v522_v37 = vsub.s32 4294967266, %v517_v33 }
  0xe4   :  { %v341_v57 = vsel %vm330_vm14, nan, %v340_v32  ;;  %v380_v26 = vsel %vm376_vm1, %v364_v53, %v379_v62  ;;  %v1498_v18 = vmul.u32.u64.low %v1451_v21, %v389_v36  ;;  %v1499_v41 = vmul.u32.u64.high %v1451_v21, %v389_v36, %v1498_v18 }
  0xe5   :  { %967 = vst [vmem:[#allocation2 + $0x8] sm:$0xff] %v341_v57  ;;  %v1502_v42 = vmul.u32.u64.low %v1451_v21, %v385_v58  ;;  %v1503_v46 = vmul.u32.u64.high %v1451_v21, %v385_v58, %v1502_v42  ;;  %v519_v34 = vshll.u32 %v1436_v54, %v517_v33  ;;  %v520_v48 = vshrl.u32 %v502_v60, %v518_v40 }
  0xe6   :  { %v523_v50 = vadd.s32 127, %v522_v37  ;;  %v1011_v49 = vadd.s32 4294967169, %v658_v31  ;;  %v1072_v51 = vpop.eup %1071  ;;  %vm229_vm5 = vcmp.lt.s32.totalorder %v1418_v24, 2  ;;  %vm230_vm6 = vcmp.eq.s32.totalorder %v1418_v24, 0 }
  0xe7   :  { %vm233_vm7 = vcmp.eq.s32.totalorder %v1418_v24, 2  ;;  %v381_v53 = vsel %vm375_vm2, %v378_v0, %v380_v26  ;;  %v1074_v55 = vpop.eup %1073  ;;  %v234_v43 = vxor.u32 2147483648, %v1072_v51  ;;  %v521_v47 = vor.u32 %v520_v48, %v519_v34 }
  0xe8   :  { %v524_v56 = vshll.u32 %v523_v50, 23  ;;  %v664_v30 = vadd.s32 1, %v1011_v49  ;;  %v231_v38 = vxor.u32 2147483648, %v1074_v55  ;;  %v539_v54 = vadd.s32 3, %v535_v4 }
  0xe9   :  { %vm399_vm8 = vc.u32 %v1499_v41, %v1502_v42  ;;  %v400_v60 = vadd.s32 1, %v1503_v46  ;;  %v235_v59 = vsel %vm233_vm7, %v234_v43, %v1074_v55  ;;  %v397_v8 = vmul.u32 %v1451_v21, %v381_v53 }
  0xea   :  { %v525_v61 = vor.u32 4788187, %v524_v56  ;;  %vm665_vm11 = vcmp.gt.s32.totalorder %v664_v30, 0  ;;  %v232_v25 = vsel %vm230_vm6, %v1072_v51, %v231_v38  ;;  %v654_v52 = vand.u32 2147483647, %v1405_v12 }
  0xeb   :  { %v401_v1 = vsel %vm399_vm8, %v400_v60, %v1503_v46  ;;  %v666_v39 = vsel %vm665_vm11, %v664_v30, 0  ;;  %v236_v2 = vsel %vm229_vm5, %v232_v25, %v235_v59  ;;  %v528_v3 = vcvt.s32.f32 %v521_v47 }
  0xec   :  { %v526_v4 = vand.u32 2147483647, %v525_v61  ;;  %v402_v45 = vadd.s32 %v401_v1, %v397_v8  ;;  %v237_v14 = vsel %vm226_vm4, nan, %v236_v2  ;;  %v668_v17 = vand.u32 31, %v666_v39 }
  0xed   :  { %966 = vst [vmem:[#allocation2] sm:$0xff] %v237_v14  ;;  %v1524_v62 = vand.u32 3, %v539_v54  ;;  %v661_v58 = vand.u32 8388607, %v654_v52  ;;  %v667_v10 = vshrl.u32 %v666_v39, 5  ;;  %v553_v24 = vand.u32 2139095040, %v1416_v19 }
  0xee   :  { %v529_v21 = vmul.f32 %v528_v3, %v526_v4  ;;  %v403_v20 = vadd.s32 536870912, %v402_v45  ;;  %v669_v16 = vsub.s32 32, %v668_v17  ;;  %v671_v31 = vshll.u32 %v1124_v5, %v668_v17 }
  0xef   :  { %v674_v35 = vshll.u32 %v1125_v9, %v668_v17  ;;  %v677_v0 = vshll.u32 %v1126_v11, %v668_v17  ;;  %v680_v37 = vshll.u32 %v1127_v13, %v668_v17  ;;  %v662_v49 = vor.u32 8388608, %v661_v58 }
  0xf0   :  { %v530_v23 = vxor.u32 2147483648, %v529_v21  ;;  %v1529_v7 = vshrl.u32 %v403_v20, 30  ;;  %v672_v32 = vshrl.u32 %v1125_v9, %v669_v16  ;;  %v675_v33 = vshrl.u32 %v1126_v11, %v669_v16 }
  0xf1   :  { %v678_v36 = vshrl.u32 %v1127_v13, %v669_v16  ;;  %v681_v26 = vshrl.u32 %v1128_v15, %v669_v16  ;;  %v683_v53 = vshll.u32 %v1128_v15, %v668_v17  ;;  %v684_v55 = vshrl.u32 %v1129_v22, %v669_v16 }
  0xf2   :  { %v531_v57 = vsel %vm448_vm9, %v530_v23, %v529_v21  ;;  %v405_v40 = vshll.u32 %v1529_v7, 30  ;;  %v673_v46 = vor.u32 %v672_v32, %v671_v31  ;;  %v676_v34 = vor.u32 %v675_v33, %v674_v35 }
  0xf3   :  { %v534_v18 = vsel %vm1424_vm10, %v1222_v44, %v531_v57  ;;  %v679_v48 = vor.u32 %v678_v36, %v677_v0  ;;  %v682_v51 = vor.u32 %v681_v26, %v680_v37  ;;  %v554_v43 = vshrl.u32 %v553_v24, 23 }
  0xf4   :  { %1075 = vcosq.f32 %v534_v18  ;;  %v1545_v50 = vsub.s32 %v402_v45, %v405_v40  ;;  %vm686_vm9 = vcmp.lt.s32.totalorder %v667_v10, 1  ;;  %vm688_vm12 = vcmp.lt.s32.totalorder %v667_v10, 3 }
  0xf5   :  { %1077 = vsinq.f32 %v534_v18  ;;  %vm689_vm13 = vcmp.lt.s32.totalorder %v667_v10, 4  ;;  %v685_v27 = vor.u32 %v684_v55, %v683_v53  ;;  %v694_v30 = vsel %vm686_vm9, %v673_v46, %v676_v34 }
  0xf6   :  { %v408_v47 = vsub.s32 0, %v1545_v50  ;;  %v691_v56 = vsel %vm689_vm13, %v679_v48, 2102212464  ;;  %v695_v38 = vsel %vm689_vm13, %v682_v51, 920167782  ;;  %v670_v60 = vshrl.u32 %v1124_v5, %v669_v16 }
  0xf7   :  { %vm687_vm10 = vcmp.lt.s32.totalorder %v667_v10, 2  ;;  %v696_v59 = vsel %vm688_vm12, %v679_v48, %v695_v38  ;;  %v698_v8 = vsel %vm686_vm9, %v676_v34, %v679_v48  ;;  %v699_v25 = vsel %vm689_vm13, %v685_v27, 1326507024 }
  0xf8   :  { %v1000_v54 = vmin.u32 %v408_v47, %v1545_v50  ;;  %v697_v61 = vsel %vm687_vm10, %v694_v30, %v696_v59  ;;  %v702_v1 = vshll.u32 %v662_v49, 8  ;;  %vm344_vm14 = vcmp.lt.s32.totalorder %v1228_v63, 0 }
  0xf9   :  { %v690_v2 = vsel %vm686_vm9, %v670_v60, %v673_v46  ;;  %v692_v4 = vsel %vm688_vm12, %v676_v34, %v691_v56  ;;  %vm538_vm0 = vweird.f32 %v1222_v44  ;;  %vm1562_vm15 = vcmp.le.f32.partialorder %v342_v6, 0.7853982 }
  0xfa   :  { %v410_v39 = vclz %v1000_v54  ;;  %v428_v45 = vsub.s32 4, %v1529_v7  ;;  %v700_v14 = vsel %vm688_vm12, %v682_v51, %v699_v25  ;;  %vm541_vm1 = vcmp.lt.s32.totalorder %v1524_v62, 2 }
  0xfb   :  { %v1568_v17 = vmul.u32.u64.low %v702_v1, %v697_v61  ;;  %v1569_v21 = vmul.u32.u64.high %v702_v1, %v697_v61, %v1568_v17  ;;  %v701_v58 = vsel %vm687_vm10, %v698_v8, %v700_v14  ;;  %v1007_v16 = vadd.s32 4294967169, %v554_v43 }
  0xfc   :  { %v1001_v20 = vadd.s32 4294967294, %v410_v39  ;;  %vm542_vm2 = vcmp.eq.s32.totalorder %v1524_v62, 0  ;;  %v693_v6 = vsel %vm687_vm10, %v690_v2, %v692_v4  ;;  %vm545_vm3 = vcmp.eq.s32.totalorder %v1524_v62, 2 }
  0xfd   :  { %v1576_v24 = vmul.u32.u64.low %v702_v1, %v701_v58  ;;  %v1577_v23 = vmul.u32.u64.high %v702_v1, %v701_v58, %v1576_v24  ;;  %v398_v35 = vadd.s32 %v1502_v42, %v1499_v41  ;;  %v560_v32 = vadd.s32 1, %v1007_v16 }
  0xfe   :  { %v1076_v31 = vpop.eup %1075  ;;  %vm1002_vm4 = vcmp.lt.s32.totalorder %v1001_v20, 0  ;;  %v429_v57 = vsel %vm344_vm14, %v428_v45, %v1529_v7  ;;  %v712_v10 = vadd.s32 1, %v1569_v21  ;;  %v709_v18 = vmul.u32 %v702_v1, %v693_v6 }
  0xff   :  { %v1078_v33 = vpop.eup %1077  ;;  %v546_v0 = vxor.u32 2147483648, %v1076_v31  ;;  %v413_v36 = vsel %vm1002_vm4, 0, %v1001_v20  ;;  %vm711_vm5 = vc.u32 %v1577_v23, %v1568_v17  ;;  %vm561_vm6 = vcmp.gt.s32.totalorder %v560_v32, 0 }
 0x100   :  { %v543_v40 = vxor.u32 2147483648, %v1078_v33  ;;  %v414_v37 = vsub.s32 32, %v413_v36  ;;  %v418_v26 = vsub.s32 4294967266, %v413_v36  ;;  %v415_v34 = vshll.u32 %v1545_v50, %v413_v36 }
 0x101   :  { %v547_v46 = vsel %vm545_vm3, %v546_v0, %v1078_v33  ;;  %v713_v7 = vsel %vm711_vm5, %v712_v10, %v1569_v21  ;;  %v550_v53 = vand.u32 2147483647, %v1416_v19  ;;  %v562_v55 = vsel %vm561_vm6, %v560_v32, 0 }
 0x102   :  { %v544_v41 = vsel %vm542_vm2, %v1076_v31, %v543_v40  ;;  %v416_v42 = vshrl.u32 %v398_v35, %v414_v37  ;;  %v419_v48 = vadd.s32 127, %v418_v26  ;;  %v714_v51 = vadd.s32 %v713_v7, %v709_v18  ;;  %v124_v31 = vpop.permute.xlu1 %123 }
 0x103   :  { %v548_v49 = vsel %vm541_vm1, %v544_v41, %v547_v46  ;;  %v431_v27 = vsel %vm1562_vm15, 0, %v429_v57  ;;  %v564_v30 = vand.u32 31, %v562_v55  ;;  %v557_v62 = vand.u32 8388607, %v550_v53 }
 0x104   :  { %v549_v50 = vsel %vm538_vm0, nan, %v548_v49  ;;  %v417_v43 = vor.u32 %v416_v42, %v415_v34  ;;  %v420_v47 = vshll.u32 %v419_v48, 23  ;;  %v715_v56 = vadd.s32 536870912, %v714_v51 }
 0x105   :  { %969 = vst [vmem:[#allocation2 + $0x18] sm:$0xff] %v549_v50  ;;  %v435_v54 = vadd.s32 3, %v431_v27  ;;  %v565_v59 = vsub.s32 32, %v564_v30  ;;  %v1603_v44 = vshrl.u32 %v562_v55, 5  ;;  %v567_v25 = vshll.u32 %v1124_v5, %v564_v30 }
 0x106   :  { %v421_v38 = vor.u32 4788187, %v420_v47  ;;  %v1599_v60 = vshrl.u32 %v715_v56, 30  ;;  %v424_v8 = vcvt.s32.f32 %v417_v43  ;;  %v570_v2 = vshll.u32 %v1125_v9, %v564_v30 }
 0x107   :  { %v568_v39 = vshrl.u32 %v1125_v9, %v565_v59  ;;  %v573_v4 = vshll.u32 %v1126_v11, %v564_v30  ;;  %v571_v14 = vshrl.u32 %v1126_v11, %v565_v59  ;;  %v574_v21 = vshrl.u32 %v1127_v13, %v565_v59 }
 0x108   :  { %v422_v61 = vand.u32 2147483647, %v421_v38  ;;  %v717_v1 = vshll.u32 %v1599_v60, 30  ;;  %v577_v20 = vshrl.u32 %v1128_v15, %v565_v59  ;;  %v1613_v58 = vand.u32 3, %v435_v54 }
 0x109   :  { %v576_v6 = vshll.u32 %v1127_v13, %v564_v30  ;;  %v580_v24 = vshrl.u32 %v1129_v22, %v565_v59  ;;  %v569_v32 = vor.u32 %v568_v39, %v567_v25  ;;  %v572_v33 = vor.u32 %v571_v14, %v570_v2 }
 0x10a   :  { %v425_v45 = vmul.f32 %v424_v8, %v422_v61  ;;  %v1615_v16 = vsub.s32 %v714_v51, %v717_v1  ;;  %v575_v0 = vor.u32 %v574_v21, %v573_v4  ;;  %v558_v57 = vor.u32 8388608, %v557_v62 }
 0x10b   :  { %v578_v10 = vor.u32 %v577_v20, %v576_v6  ;;  %v579_v40 = vshll.u32 %v1128_v15, %v564_v30  ;;  %v566_v26 = vshrl.u32 %v1124_v5, %v565_v59  ;;  %vm582_vm7 = vcmp.lt.s32.totalorder %v1603_v44, 1 }
 0x10c   :  { %v426_v35 = vxor.u32 2147483648, %v425_v45  ;;  %v720_v36 = vsub.s32 0, %v1615_v16  ;;  %v1626_v18 = vadd.f32 %v124_v31, %v1208_v28  ;;  %vm585_vm8 = vcmp.lt.s32.totalorder %v1603_v44, 4 }
 0x10d   :  { %v581_v41 = vor.u32 %v580_v24, %v579_v40  ;;  %v587_v42 = vsel %vm585_vm8, %v575_v0, 2102212464  ;;  %v590_v48 = vsel %vm582_vm7, %v569_v32, %v572_v33  ;;  %v591_v28 = vsel %vm585_vm8, %v578_v10, 920167782 }
 0x10e   :  { %v427_v37 = vsel %vm344_vm14, %v426_v35, %v425_v45  ;;  %v1012_v34 = vmin.u32 %v720_v36, %v1615_v16  ;;  %vm656_vm11 = vcmp.lt.s32.totalorder %v1405_v12, 0  ;;  %vm584_vm9 = vcmp.lt.s32.totalorder %v1603_v44, 3  ;;  %v119_v35 = vpop.permute.xlu0 %118 }
 0x10f   :  { %v430_v46 = vsel %vm1562_vm15, %v1228_v63, %v427_v37  ;;  %v598_v7 = vshll.u32 %v558_v57, 8  ;;  %vm583_vm12 = vcmp.lt.s32.totalorder %v1603_v44, 2  ;;  %v586_v49 = vsel %vm582_vm7, %v566_v26, %v569_v32 }
 0x110   :  { %1079 = vcosq.f32 %v430_v46  ;;  %v722_v3 = vclz %v1012_v34  ;;  %v592_v51 = vsel %vm584_vm9, %v575_v0, %v591_v28  ;;  %v594_v55 = vsel %vm582_vm7, %v572_v33, %v575_v0 }
 0x111   :  { %1081 = vsinq.f32 %v430_v46  ;;  %v588_v43 = vsel %vm584_vm9, %v572_v33, %v587_v42  ;;  %v593_v47 = vsel %vm583_vm12, %v590_v48, %v592_v51  ;;  %v595_v27 = vsel %vm585_vm8, %v581_v41, 1326507024 }
 0x112   :  { %v1013_v50 = vadd.s32 4294967294, %v722_v3  ;;  %v596_v56 = vsel %vm584_vm9, %v578_v10, %v595_v27  ;;  %v1650_v30 = vmul.u32.u64.low %v598_v7, %v593_v47  ;;  %v1651_v38 = vmul.u32.u64.high %v598_v7, %v593_v47, %v1650_v30 }
 0x113   :  { %v865_v54 = vand.u32 2139095040, %v1626_v18  ;;  %vm1657_vm13 = vcmp.le.f32.partialorder %v654_v52, 0.7853982  ;;  %v740_v59 = vsub.s32 4, %v1599_v60  ;;  %v597_v61 = vsel %vm583_vm12, %v594_v55, %v596_v56 }
 0x114   :  { %vm1014_vm10 = vcmp.lt.s32.totalorder %v1013_v50, 0  ;;  %vm437_vm14 = vcmp.lt.s32.totalorder %v1613_v58, 2  ;;  %v1665_v25 = vmul.u32.u64.low %v598_v7, %v597_v61  ;;  %v1666_v1 = vmul.u32.u64.high %v598_v7, %v597_v61, %v1665_v25 }
 0x115   :  { %v725_v8 = vsel %vm1014_vm10, 0, %v1013_v50  ;;  %v866_v39 = vshrl.u32 %v865_v54, 23  ;;  %v710_v2 = vadd.s32 %v1568_v17, %v1577_v23  ;;  %v589_v45 = vsel %vm583_vm12, %v586_v49, %v588_v43 }
 0x116   :  { %v726_v52 = vsub.s32 32, %v725_v8  ;;  %v730_v4 = vsub.s32 4294967266, %v725_v8  ;;  %vm438_vm0 = vcmp.eq.s32.totalorder %v1613_v58, 0  ;;  %vm441_vm15 = vcmp.eq.s32.totalorder %v1613_v58, 2 }
 0x117   :  { %v608_v14 = vadd.s32 1, %v1651_v38  ;;  %v1019_v21 = vadd.s32 4294967169, %v866_v39  ;;  %v727_v20 = vshll.u32 %v1615_v16, %v725_v8  ;;  %v862_v31 = vand.u32 2147483647, %v1626_v18 }
 0x118   :  { %v728_v6 = vshrl.u32 %v710_v2, %v726_v52  ;;  %v731_v24 = vadd.s32 127, %v730_v4  ;;  %v741_v23 = vsel %vm656_vm11, %v740_v59, %v1599_v60  ;;  %v605_v44 = vmul.u32 %v598_v7, %v589_v45 }
 0x119   :  { %vm607_vm1 = vc.u32 %v1666_v1, %v1650_v30  ;;  %v872_v32 = vadd.s32 1, %v1019_v21  ;;  %v1684_v37 = vadd.f32 %v119_v35, %v1210_v29  ;;  %v743_v46 = vsel %vm1657_vm13, 0, %v741_v23 }
 0x11a   :  { %v1080_v17 = vpop.eup %1079  ;;  %v729_v36 = vor.u32 %v728_v6, %v727_v20  ;;  %v732_v57 = vshll.u32 %v731_v24, 23  ;;  %v609_v16 = vsel %vm607_vm1, %v608_v14, %v1651_v38  ;;  %v869_v48 = vand.u32 8388607, %v862_v31 }
 0x11b   :  { %v1082_v33 = vpop.eup %1081  ;;  %v442_v0 = vxor.u32 2147483648, %v1080_v17  ;;  %v610_v40 = vadd.s32 %v609_v16, %v605_v44  ;;  %vm873_vm2 = vcmp.gt.s32.totalorder %v872_v32, 0  ;;  %vm434_vm3 = vweird.f32 %v1228_v63 }
 0x11c   :  { %v439_v10 = vxor.u32 2147483648, %v1082_v33  ;;  %v733_v26 = vor.u32 4788187, %v732_v57  ;;  %v874_v34 = vsel %vm873_vm2, %v872_v32, 0  ;;  %v736_v7 = vcvt.s32.f32 %v729_v36 }
 0x11d   :  { %v443_v60 = vsel %vm441_vm15, %v442_v0, %v1082_v33  ;;  %v611_v42 = vadd.s32 536870912, %v610_v40  ;;  %v876_v28 = vand.u32 31, %v874_v34  ;;  %v761_v50 = vand.u32 2139095040, %v1684_v37 }
 0x11e   :  { %v440_v41 = vsel %vm438_vm0, %v1080_v17, %v439_v10  ;;  %v734_v3 = vand.u32 2147483647, %v733_v26  ;;  %v747_v47 = vadd.s32 3, %v743_v46  ;;  %v870_v56 = vor.u32 8388608, %v869_v48 }
 0x11f   :  { %v444_v29 = vsel %vm437_vm14, %v440_v41, %v443_v60  ;;  %v1697_v51 = vshrl.u32 %v611_v42, 30  ;;  %v877_v55 = vsub.s32 32, %v876_v28  ;;  %v879_v38 = vshll.u32 %v1124_v5, %v876_v28 }
 0x120   :  { %v445_v49 = vsel %vm434_vm3, nan, %v444_v29  ;;  %v737_v43 = vmul.f32 %v736_v7, %v734_v3  ;;  %v875_v25 = vshrl.u32 %v874_v34, 5  ;;  %v882_v39 = vshll.u32 %v1125_v9, %v876_v28 }
 0x121   :  { %968 = vst [vmem:[#allocation2 + $0x10] sm:$0xff] %v445_v49  ;;  %v613_v27 = vshll.u32 %v1697_v51, 30  ;;  %v880_v63 = vshrl.u32 %v1125_v9, %v877_v55  ;;  %v883_v54 = vshrl.u32 %v1126_v11, %v877_v55  ;;  %v886_v59 = vshrl.u32 %v1127_v13, %v877_v55 }
 0x122   :  { %v738_v58 = vxor.u32 2147483648, %v737_v43  ;;  %v889_v61 = vshrl.u32 %v1128_v15, %v877_v55  ;;  %v762_v2 = vshrl.u32 %v761_v50, 23  ;;  %v885_v45 = vshll.u32 %v1126_v11, %v876_v28 }
 0x123   :  { %v1706_v8 = vsub.s32 %v610_v40, %v613_v27  ;;  %v881_v4 = vor.u32 %v880_v63, %v879_v38  ;;  %v888_v14 = vshll.u32 %v1127_v13, %v876_v28  ;;  %v884_v6 = vor.u32 %v883_v54, %v882_v39 }
 0x124   :  { %v739_v52 = vsel %vm656_vm11, %v738_v58, %v737_v43  ;;  %v891_v24 = vshll.u32 %v1128_v15, %v876_v28  ;;  %v887_v35 = vor.u32 %v886_v59, %v885_v45  ;;  %v892_v23 = vshrl.u32 %v1129_v22, %v877_v55 }
 0x125   :  { %v742_v21 = vsel %vm1657_vm13, %v1405_v12, %v739_v52  ;;  %v616_v20 = vsub.s32 0, %v1706_v8  ;;  %v890_v17 = vor.u32 %v889_v61, %v888_v14  ;;  %v748_v44 = vand.u32 3, %v747_v47 }
 0x126   :  { %1083 = vcosq.f32 %v742_v21  ;;  %v910_v33 = vshll.u32 %v870_v56, 8  ;;  %v878_v0 = vshrl.u32 %v1124_v5, %v877_v55  ;;  %v893_v36 = vor.u32 %v892_v23, %v891_v24 }
 0x127   :  { %1085 = vsinq.f32 %v742_v21  ;;  %v1008_v32 = vmin.u32 %v616_v20, %v1706_v8  ;;  %vm894_vm4 = vcmp.lt.s32.totalorder %v875_v25, 1  ;;  %v1015_v62 = vadd.s32 4294967169, %v762_v2 }
 0x128   :  { %vm896_vm5 = vcmp.lt.s32.totalorder %v875_v25, 3  ;;  %vm897_vm6 = vcmp.lt.s32.totalorder %v875_v25, 4  ;;  %v902_v16 = vsel %vm894_vm4, %v881_v4, %v884_v6  ;;  %v906_v60 = vsel %vm894_vm4, %v884_v6, %v887_v35 }
 0x129   :  { %v618_v57 = vclz %v1008_v32  ;;  %v899_v10 = vsel %vm897_vm6, %v887_v35, 2102212464  ;;  %v903_v40 = vsel %vm897_vm6, %v890_v17, 920167782  ;;  %v907_v26 = vsel %vm897_vm6, %v893_v36, 1326507024 }
 0x12a   :  { %vm895_vm7 = vcmp.lt.s32.totalorder %v875_v25, 2  ;;  %v904_v34 = vsel %vm896_vm5, %v887_v35, %v903_v40  ;;  %v908_v41 = vsel %vm896_vm5, %v890_v17, %v907_v26  ;;  %vm749_vm8 = vcmp.lt.s32.totalorder %v748_v44, 2 }
 0x12b   :  { %v1009_v46 = vadd.s32 4294967294, %v618_v57  ;;  %vm552_vm11 = vcmp.lt.s32.totalorder %v1416_v19, 0  ;;  %v898_v42 = vsel %vm894_vm4, %v878_v0, %v881_v4  ;;  %v905_v48 = vsel %vm895_vm7, %v902_v16, %v904_v34 }
 0x12c   :  { %v909_v28 = vsel %vm895_vm7, %v906_v60, %v908_v41  ;;  %vm746_vm9 = vweird.f32 %v1405_v12  ;;  %v900_v29 = vsel %vm896_vm5, %v884_v6, %v899_v10  ;;  %v768_v43 = vadd.s32 1, %v1015_v62 }
 0x12d   :  { %vm1010_vm12 = vcmp.lt.s32.totalorder %v1009_v46, 0  ;;  %v1731_v3 = vmul.u32.u64.low %v910_v33, %v909_v28  ;;  %v1732_v7 = vmul.u32.u64.high %v910_v33, %v909_v28, %v1731_v3  ;;  %vm750_vm13 = vcmp.eq.s32.totalorder %v748_v44, 0 }
 0x12e   :  { %v621_v49 = vsel %vm1010_vm12, 0, %v1009_v46  ;;  %v1734_v55 = vmul.u32.u64.low %v910_v33, %v905_v48  ;;  %v1735_v50 = vmul.u32.u64.high %v910_v33, %v905_v48, %v1734_v55  ;;  %v606_v47 = vadd.s32 %v1650_v30, %v1666_v1 }
 0x12f   :  { %v622_v27 = vsub.s32 32, %v621_v49  ;;  %v626_v56 = vsub.s32 4294967266, %v621_v49  ;;  %vm753_vm10 = vcmp.eq.s32.totalorder %v748_v44, 2  ;;  %v636_v63 = vsub.s32 4, %v1697_v51 }
 0x130   :  { %v1084_v38 = vpop.eup %1083  ;;  %v901_v58 = vsel %vm895_vm7, %v898_v42, %v900_v29  ;;  %vm769_vm14 = vcmp.gt.s32.totalorder %v768_v43, 0  ;;  %v623_v61 = vshll.u32 %v1706_v8, %v621_v49  ;;  %vm919_vm0 = vc.u32 %v1732_v7, %v1734_v55 }
 0x131   :  { %v1086_v54 = vpop.eup %1085  ;;  %v754_v59 = vxor.u32 2147483648, %v1084_v38  ;;  %v624_v39 = vshrl.u32 %v606_v47, %v622_v27  ;;  %v627_v2 = vadd.s32 127, %v626_v56  ;;  %v920_v30 = vadd.s32 1, %v1735_v50 }
 0x132   :  { %v751_v52 = vxor.u32 2147483648, %v1086_v54  ;;  %v770_v1 = vsel %vm769_vm14, %v768_v43, 0  ;;  %v917_v21 = vmul.u32 %v910_v33, %v901_v58  ;;  %v758_v6 = vand.u32 2147483647, %v1684_v37 }
 0x133   :  { %v755_v4 = vsel %vm753_vm10, %v754_v59, %v1086_v54  ;;  %v625_v45 = vor.u32 %v624_v39, %v623_v61  ;;  %v628_v14 = vshll.u32 %v627_v2, 23  ;;  %v921_v20 = vsel %vm919_vm0, %v920_v30, %v1735_v50 }
 0x134   :  { %v752_v25 = vsel %vm750_vm13, %v1084_v38, %v751_v52  ;;  %v772_v8 = vand.u32 31, %v770_v1  ;;  %v637_v17 = vsel %vm552_vm11, %v636_v63, %v1697_v51  ;;  %v922_v23 = vadd.s32 %v921_v20, %v917_v21 }
 0x135   :  { %v756_v24 = vsel %vm749_vm8, %v752_v25, %v755_v4  ;;  %v629_v35 = vor.u32 4788187, %v628_v14  ;;  %vm1757_vm15 = vcmp.le.f32.partialorder %v550_v53, 0.7853982  ;;  %v632_v44 = vcvt.s32.f32 %v625_v45 }
 0x136   :  { %v757_v32 = vsel %vm746_vm9, nan, %v756_v24  ;;  %v773_v0 = vsub.s32 32, %v772_v8  ;;  %v923_v62 = vadd.s32 536870912, %v922_v23  ;;  %v639_v57 = vsel %vm1757_vm15, 0, %v637_v17 }
 0x137   :  { %971 = vst [vmem:[#allocation2 + $0x28] sm:$0xff] %v757_v32  ;;  %v630_v36 = vand.u32 2147483647, %v629_v35  ;;  %v765_v51 = vand.u32 8388607, %v758_v6  ;;  %v775_v26 = vshll.u32 %v1124_v5, %v772_v8  ;;  %v778_v46 = vshll.u32 %v1125_v9, %v772_v8 }
 0x138   :  { %v776_v12 = vshrl.u32 %v1125_v9, %v773_v0  ;;  %v779_v16 = vshrl.u32 %v1126_v11, %v773_v0  ;;  %v1767_v40 = vshrl.u32 %v923_v62, 30  ;;  %v782_v53 = vshrl.u32 %v1127_v13, %v773_v0 }
 0x139   :  { %v633_v10 = vmul.f32 %v632_v44, %v630_v36  ;;  %v785_v60 = vshrl.u32 %v1128_v15, %v773_v0  ;;  %v784_v34 = vshll.u32 %v1127_v13, %v772_v8  ;;  %v788_v41 = vshrl.u32 %v1129_v22, %v773_v0 }
 0x13a   :  { %v925_v48 = vshll.u32 %v1767_v40, 30  ;;  %v771_v28 = vshrl.u32 %v770_v1, 5  ;;  %v781_v29 = vshll.u32 %v1126_v11, %v772_v8  ;;  %v777_v3 = vor.u32 %v776_v12, %v775_v26 }
 0x13b   :  { %v634_v42 = vxor.u32 2147483648, %v633_v10  ;;  %v780_v49 = vor.u32 %v779_v16, %v778_v46  ;;  %v786_v50 = vor.u32 %v785_v60, %v784_v34  ;;  %v787_v43 = vshll.u32 %v1128_v15, %v772_v8 }
 0x13c   :  { %v643_v27 = vadd.s32 3, %v639_v57  ;;  %v926_v9 = vsub.s32 %v922_v23, %v925_v48  ;;  %v783_v56 = vor.u32 %v782_v53, %v781_v29  ;;  %v766_v22 = vor.u32 8388608, %v765_v51 }
 0x13d   :  { %v635_v47 = vsel %vm552_vm11, %v634_v42, %v633_v10  ;;  %v774_v38 = vshrl.u32 %v1124_v5, %v773_v0  ;;  %v789_v63 = vor.u32 %v788_v41, %v787_v43  ;;  %vm790_vm1 = vcmp.lt.s32.totalorder %v771_v28, 1 }
 0x13e   :  { %v638_v13 = vsel %vm1757_vm15, %v1416_v19, %v635_v47  ;;  %v928_v11 = vsub.s32 0, %v926_v9  ;;  %vm793_vm2 = vcmp.lt.s32.totalorder %v771_v28, 4  ;;  %vm792_vm3 = vcmp.lt.s32.totalorder %v771_v28, 3 }
 0x13f   :  { %1087 = vcosq.f32 %v638_v13  ;;  %v798_v15 = vsel %vm790_vm1, %v777_v3, %v780_v49  ;;  %v799_v58 = vsel %vm793_vm2, %v786_v50, 920167782  ;;  %vm791_vm4 = vcmp.lt.s32.totalorder %v771_v28, 2 }
 0x140   :  { %1089 = vsinq.f32 %v638_v13  ;;  %v1020_v54 = vmin.u32 %v928_v11, %v926_v9  ;;  %v795_v59 = vsel %vm793_vm2, %v783_v56, 2102212464  ;;  %v800_v61 = vsel %vm792_vm3, %v783_v56, %v799_v58 }
 0x141   :  { %v801_v39 = vsel %vm791_vm4, %v798_v15, %v800_v61  ;;  %v802_v2 = vsel %vm790_vm1, %v780_v49, %v783_v56  ;;  %v803_v52 = vsel %vm793_vm2, %v789_v63, 1326507024  ;;  %v806_v30 = vshll.u32 %v766_v22, 8 }
 0x142   :  { %v930_v1 = vclz %v1020_v54  ;;  %v794_v5 = vsel %vm790_vm1, %v774_v38, %v777_v3  ;;  %v796_v4 = vsel %vm792_vm3, %v780_v49, %v795_v59  ;;  %v804_v45 = vsel %vm792_vm3, %v786_v50, %v803_v52 }
 0x143   :  { %v1785_v14 = vmul.u32.u64.low %v806_v30, %v801_v39  ;;  %v1786_v21 = vmul.u32.u64.high %v806_v30, %v801_v39, %v1785_v14  ;;  %v644_v25 = vand.u32 3, %v643_v27  ;;  %v805_v8 = vsel %vm791_vm4, %v802_v2, %v804_v45 }
 0x144   :  { %v1021_v20 = vadd.s32 4294967294, %v930_v1  ;;  %v1789_v24 = vmul.u32.u64.low %v806_v30, %v805_v8  ;;  %v1790_v35 = vmul.u32.u64.high %v806_v30, %v805_v8, %v1789_v24  ;;  %v797_v17 = vsel %vm791_vm4, %v794_v5, %v796_v4 }
 0x145   :  { %v816_v32 = vadd.s32 1, %v1786_v21  ;;  %vm649_vm6 = vcmp.eq.s32.totalorder %v644_v25, 2  ;;  %v918_v33 = vadd.s32 %v1734_v55, %v1732_v7  ;;  %v813_v12 = vmul.u32 %v806_v30, %v797_v17 }
 0x146   :  { %vm1022_vm5 = vcmp.lt.s32.totalorder %v1021_v20, 0  ;;  %vm815_vm7 = vc.u32 %v1790_v35, %v1785_v14  ;;  %vm646_vm8 = vcmp.eq.s32.totalorder %v644_v25, 0  ;;  %vm645_vm11 = vcmp.lt.s32.totalorder %v644_v25, 2 }
 0x147   :  { %v933_v23 = vsel %vm1022_vm5, 0, %v1021_v20  ;;  %v817_v60 = vsel %vm815_vm7, %v816_v32, %v1786_v21  ;;  %vm642_vm9 = vweird.f32 %v1416_v19  ;;  %v948_v47 = vsub.s32 4, %v1767_v40 }
 0x148   :  { %v934_v36 = vsub.s32 32, %v933_v23  ;;  %v938_v44 = vsub.s32 4294967266, %v933_v23  ;;  %v935_v51 = vshll.u32 %v926_v9, %v933_v23  ;;  %v818_v46 = vadd.s32 %v817_v60, %v813_v12 }
 0x149   :  { %v1088_v0 = vpop.eup %1087  ;;  %vm864_vm12 = vcmp.lt.s32.totalorder %v1626_v18, 0  ;;  %vm863_vm13 = vcmp.le.f32.partialorder %v862_v31, 0.7853982  ;;  %v814_v59 = vadd.s32 %v1785_v14, %v1790_v35  ;;  %vm954_vm1 = vweird.f32 %v1626_v18 }
 0x14a   :  { %v1090_v62 = vpop.eup %1089  ;;  %v650_v57 = vxor.u32 2147483648, %v1088_v0  ;;  %v936_v10 = vshrl.u32 %v918_v33, %v934_v36  ;;  %v939_v53 = vadd.s32 127, %v938_v44  ;;  %v819_v42 = vadd.s32 536870912, %v818_v46 }
 0x14b   :  { %v647_v16 = vxor.u32 2147483648, %v1090_v62  ;;  %v949_v13 = vsel %vm864_vm12, %v948_v47, %v1767_v40  ;;  %vm760_vm2 = vcmp.lt.s32.totalorder %v1684_v37, 0  ;;  %vm759_vm3 = vcmp.le.f32.partialorder %v758_v6, 0.7853982 }
 0x14c   :  { %v651_v26 = vsel %vm649_vm6, %v650_v57, %v1090_v62  ;;  %v937_v41 = vor.u32 %v936_v10, %v935_v51  ;;  %v940_v7 = vshll.u32 %v939_v53, 23  ;;  %v820_v29 = vshrl.u32 %v819_v42, 30 }
 0x14d   :  { %v648_v34 = vsel %vm646_vm8, %v1088_v0, %v647_v16  ;;  %v951_v63 = vsel %vm863_vm13, 0, %v949_v13  ;;  %vm850_vm7 = vweird.f32 %v1684_v37 }
 0x14e   :  { %v652_v55 = vsel %vm645_vm11, %v648_v34, %v651_v26  ;;  %v941_v28 = vor.u32 4788187, %v940_v7  ;;  %v944_v49 = vcvt.s32.f32 %v937_v41  ;;  %v821_v50 = vshll.u32 %v820_v29, 30 }
 0x14f   :  { %v653_v48 = vsel %vm642_vm9, nan, %v652_v55  ;;  %v955_v58 = vadd.s32 3, %v951_v63  ;;  %v844_v32 = vsub.s32 4, %v820_v29 }
 0x150   :  { %970 = vst [vmem:[#allocation2 + $0x20] sm:$0xff] %v653_v48  ;;  %v942_v3 = vand.u32 2147483647, %v941_v28  ;;  %v822_v27 = vsub.s32 %v818_v46, %v821_v50 }
 0x151   :  { %v956_v2 = vand.u32 3, %v955_v58  ;;  %v845_v36 = vsel %vm760_vm2, %v844_v32, %v820_v29 }
 0x152   :  { %v945_v43 = vmul.f32 %v944_v49, %v942_v3  ;;  %v824_v56 = vsub.s32 0, %v822_v27  ;;  %v847_v62 = vsel %vm759_vm3, 0, %v845_v36 }
 0x153   :  { %vm961_vm14 = vcmp.eq.s32.totalorder %v956_v2, 2  ;;  %vm958_vm0 = vcmp.eq.s32.totalorder %v956_v2, 0  ;;  %vm957_vm15 = vcmp.lt.s32.totalorder %v956_v2, 2 }
 0x154   :  { %v946_v9 = vxor.u32 2147483648, %v945_v43  ;;  %v1016_v38 = vmin.u32 %v824_v56, %v822_v27 }
 0x156   :  { %v947_v19 = vsel %vm864_vm12, %v946_v9, %v945_v43  ;;  %v826_v11 = vclz %v1016_v38 }
 0x157   :  { %v950_v22 = vsel %vm863_vm13, %v1626_v18, %v947_v19  ;;  %v851_v18 = vadd.s32 3, %v847_v62 }
 0x158   :  { %1091 = vcosq.f32 %v950_v22  ;;  %v1017_v15 = vadd.s32 4294967294, %v826_v11 }
 0x159   :  { %1093 = vsinq.f32 %v950_v22  ;;  %v852_v57 = vand.u32 3, %v851_v18 }
 0x15a   :  { %vm1018_vm10 = vcmp.lt.s32.totalorder %v1017_v15, 0 }
 0x15b   :  { %v829_v54 = vsel %vm1018_vm10, 0, %v1017_v15  ;;  %vm857_vm4 = vcmp.eq.s32.totalorder %v852_v57, 2  ;;  %vm854_vm5 = vcmp.eq.s32.totalorder %v852_v57, 0  ;;  %vm853_vm6 = vcmp.lt.s32.totalorder %v852_v57, 2 }
 0x15c   :  { %v830_v61 = vsub.s32 32, %v829_v54  ;;  %v834_v39 = vsub.s32 4294967266, %v829_v54  ;;  %v831_v31 = vshll.u32 %v822_v27, %v829_v54 }
 0x15e   :  { %v832_v52 = vshrl.u32 %v814_v59, %v830_v61  ;;  %v835_v30 = vadd.s32 127, %v834_v39 }
 0x160   :  { %v833_v4 = vor.u32 %v832_v52, %v831_v31  ;;  %v836_v45 = vshll.u32 %v835_v30, 23 }
 0x162   :  { %v1092_v40 = vpop.eup %1091  ;;  %v837_v20 = vor.u32 4788187, %v836_v45  ;;  %v840_v35 = vcvt.s32.f32 %v833_v4 }
 0x163   :  { %v1094_v1 = vpop.eup %1093  ;;  %v962_v5 = vxor.u32 2147483648, %v1092_v40 }
 0x164   :  { %v959_v21 = vxor.u32 2147483648, %v1094_v1  ;;  %v838_v24 = vand.u32 2147483647, %v837_v20 }
 0x165   :  { %v963_v25 = vsel %vm961_vm14, %v962_v5, %v1094_v1 }
 0x166   :  { %v960_v8 = vsel %vm958_vm0, %v1092_v40, %v959_v21  ;;  %v841_v23 = vmul.f32 %v840_v35, %v838_v24 }
 0x167   :  { %v964_v14 = vsel %vm957_vm15, %v960_v8, %v963_v25 }
 0x168   :  { %v965_v17 = vsel %vm954_vm1, nan, %v964_v14  ;;  %v842_v0 = vxor.u32 2147483648, %v841_v23 }
 0x169   :  { %973 = vst [vmem:[#allocation2 + $0x38] sm:$0xff] %v965_v17 }
 0x16a   :  { %v843_v33 = vsel %vm760_vm2, %v842_v0, %v841_v23 }
 0x16b   :  { %v846_v44 = vsel %vm759_vm3, %v1684_v37, %v843_v33 }
 0x16c   :  { %1095 = vcosq.f32 %v846_v44 }
 0x16d   :  { %1097 = vsinq.f32 %v846_v44 }
 0x176   :  { %v1096_v51 = vpop.eup %1095 }
 0x177   :  { %v1098_v12 = vpop.eup %1097  ;;  %v858_v16 = vxor.u32 2147483648, %v1096_v51 }
 0x178   :  { %v855_v10 = vxor.u32 2147483648, %v1098_v12 }
 0x179   :  { %v859_v53 = vsel %vm857_vm4, %v858_v16, %v1098_v12 }
 0x17a   :  { %v856_v6 = vsel %vm854_vm5, %v1096_v51, %v855_v10 }
 0x17b   :  { %v860_v60 = vsel %vm853_vm6, %v856_v6, %v859_v53 }
 0x17c   :  { %v861_v26 = vsel %vm850_vm7, nan, %v860_v60 }
 0x17d   :  { %972 = vst [vmem:[#allocation2 + $0x30] sm:$0xff] %v861_v26 }
 0x17e   :  { %1110 = shalt.err (!%p1107_p4)
}
 0x17f   :  { %s1111_s21 = scalar_lea.hbm %s1827_s3, 1024 }
 0x180   :  { %p1112_p5 = scmp.ne.s32.totalorder %s1827_s3, %s1111_s21  ;;  %p1115_p6 = scmp.lt.u32.totalorder %s1111_s21, %s1827_s3 }
 0x182   :  { %p1117_p7 = pnand %p1115_p6, %p1112_p5 }
 0x184   :  { %1120 = shalt.err (!%p1117_p7)
}
 0x185   :  { %s1131_s26 = smov 128   ;;  %s1132_s27 = smov 8  }
 0x186   :  { %985 = dma.vmem_to_hbm [thread:$0]  %s980_s2, 1024, %s1827_s3, [#allocation3], %s1131_s26, %s1131_s26, %s1132_s27  }
 0x187   :  { %1121 = dma.done.wait [#allocation3], 1024  }
 0x188   :  { %1122 = vsyncadd [#allocation3], 4294966272 }
 0x189   :  { %989 = vsyncpa [#allocation3], 1 }

</bundles_post_ra>
